<compile_context>
chip_gen: v7x
topology: tpu7x:2x2x1
jax: 0.10.0
libtpu: 0.0.40
codegen_flags: <defaults>
</compile_context>

<pallas_src>
import functools

import jax
import jax.numpy as jnp
from jax import lax
from jax.experimental import pallas as pl
from jax.experimental.pallas import tpu as pltpu


def _round_up(x, m):
    return ((x + m - 1) // m) * m


# ---------------------------------------------------------------------------
# Fused NF_Block kernel: one grid step = `nb` batch images stacked along M.
# ---------------------------------------------------------------------------
def nf_block_kernel(xp_ref, t1_ref, b1_ref, t2_ref, b2_ref, out_ref, *,
                    nb, H, lanes_in, lanes_out):
    f32, bf16 = jnp.float32, jnp.bfloat16
    M = nb * H

    xp = xp_ref[...]                                    # (nb, H+4, lanes_in) bf16

    def tap(s):
        # kh row window of the padded slab, stacked over the image block.
        return xp[:, s:s + H, :].reshape(M, lanes_in)

    # ---- conv1: 3x3, pad 2, dil 2 -- all 3 kh taps fused along K -----------
    lhs1 = jnp.concatenate([tap(0), tap(2), tap(4)], axis=1)       # (M, 3*lanes_in)
    acc1 = jnp.dot(lhs1, t1_ref[...], preferred_element_type=f32)  # (M, lanes_out)
    act1 = jnp.maximum(acc1 + b1_ref[...], 0.0).astype(bf16)

    # ---- conv2 H taps: row-shifted act1, per-image halo rows zeroed ---------
    zrow = jnp.zeros((1, lanes_out), bf16)
    act_dn = jnp.concatenate([zrow, act1[:M - 1, :]], axis=0)      # row m -> act1[m-1]
    act_up = jnp.concatenate([act1[1:, :], zrow], axis=0)          # row m -> act1[m+1]
    h_id = lax.broadcasted_iota(jnp.int32, (M, lanes_out), 0) % H
    act_dn = jnp.where(h_id == 0, jnp.zeros_like(act_dn), act_dn)
    act_up = jnp.where(h_id == H - 1, jnp.zeros_like(act_up), act_up)

    # ---- conv2 (3x3, pad 1) + 1x1 shortcut fused along K --------------------
    # Shortcut operand = full-width, lane-aligned padded-slab rows (offset=2
    # is baked into the band weight).
    lhs2 = jnp.concatenate([act_dn, act1, act_up, tap(2)], axis=1)  # (M, 3*lo+li)
    acc2 = jnp.dot(lhs2, t2_ref[...], preferred_element_type=f32)
    out_ref[...] = jnp.maximum(acc2 + b2_ref[...], 0.0).astype(out_ref.dtype)


# ---------------------------------------------------------------------------
# Parameter helpers (plain-JAX glue).
# ---------------------------------------------------------------------------
def ws_standardize(w, gain, eps=1e-4):
    """nfnets-pytorch WSConv2d.standardized_weights(); w is (Cout, Cin, Kh, Kw)."""
    fan_in = w.shape[1] * w.shape[2] * w.shape[3]
    mean = jnp.mean(w, axis=(1, 2, 3), keepdims=True)
    var = jnp.var(w, axis=(1, 2, 3), keepdims=True, ddof=1)   # torch.var (unbiased)
    scale = lax.rsqrt(jnp.maximum(var * fan_in, eps))
    return (w - mean) * scale * gain


def band_weight(w_kh, w_out, w_in, offset, dil):
    """Fold the kw taps and the spatial W axis of a conv row into one matmul weight.

    w_kh: (Cout, Cin, Kw) filter slice for a fixed kh.  Returns T of shape
    (w_in*Cin, w_out*Cout) such that for an input row-slab x laid out as
    [w_in, Cin]:  (x @ T)[w*Cout + co] = sum_{kw,c} x[w + dil*kw + offset, c]
    * w_kh[co, c, kw], with out-of-range input columns contributing zero
    (i.e. W-padding is baked into the weight).
    """
    cout, cin, ktaps = w_kh.shape
    t = jnp.zeros((w_in * cin, w_out * cout), jnp.float32)
    for kw in range(ktaps):
        shift = dil * kw + offset
        sel = jnp.eye(w_in, w_out, k=-shift, dtype=jnp.float32)   # sel[w+shift, w] = 1
        t = t + jnp.kron(sel, jnp.transpose(w_kh[:, :, kw]))      # (Cin, Cout) blocks
    return t


def pad_to(mat, rows, cols):
    return jnp.pad(mat, ((0, rows - mat.shape[0]), (0, cols - mat.shape[1])))


def init_nf_block_params(key, in_channels, out_channels):
    k = jax.random.split(key, 6)

    def xavier_normal(key, shape):  # shape = (Cout, Cin, Kh, Kw)
        fan_in = shape[1] * shape[2] * shape[3]
        fan_out = shape[0] * shape[2] * shape[3]
        std = (2.0 / (fan_in + fan_out)) ** 0.5
        return std * jax.random.normal(key, shape, jnp.float32)

    return {
        "w1": xavier_normal(k[0], (out_channels, in_channels, 3, 3)),
        "b1": 0.1 * jax.random.normal(k[1], (out_channels,), jnp.float32),
        "g1": jnp.ones((out_channels, 1, 1, 1), jnp.float32),
        "w2": xavier_normal(k[2], (out_channels, out_channels, 3, 3)),
        "b2": 0.1 * jax.random.normal(k[3], (out_channels,), jnp.float32),
        "g2": jnp.ones((out_channels, 1, 1, 1), jnp.float32),
        "wsc": xavier_normal(k[4], (out_channels, in_channels, 1, 1)),
        "bsc": 0.1 * jax.random.normal(k[5], (out_channels,), jnp.float32),
        "gsc": jnp.ones((out_channels, 1, 1, 1), jnp.float32),
    }


def _pick_batch_block(n, h):
    """Images per grid step: fold the batch into matmul M (target ~256 rows),
    but keep >= 2 grid steps when the batch allows it (v7x has 2 TensorCores)."""
    target = max(1, 256 // max(h, 1))
    nb = min(n, target)
    if n >= 2:
        nb = min(nb, max(1, n // 2))
    while n % nb:
        nb -= 1
    return nb


# ---------------------------------------------------------------------------
# Wrapper: NCHW in, NCHW out (matches the PyTorch module).
# ---------------------------------------------------------------------------
def nf_block_forward(x_nchw, params):
    N, cin, H, W = x_nchw.shape
    cout = params["w1"].shape[0]
    lanes_in = _round_up((W + 4) * cin, 128)    # padded-slab lane width
    lanes_out = _round_up(W * cout, 128)        # activation / output lane width

    # Weight standardization (tiny parameter preprocessing, plain JAX).
    w1s = ws_standardize(params["w1"], params["g1"])
    w2s = ws_standardize(params["w2"], params["g2"])
    wscs = ws_standardize(params["wsc"], params["gsc"])

    # conv1: 3 kh taps (offset 0, dilation 2 vs. the padded slab), lane-padded
    # with zero K-rows and stacked along K -> one long-K matmul weight.
    t1 = jnp.concatenate(
        [pad_to(band_weight(w1s[:, :, kh, :], W, W + 4, 0, 2), lanes_in, lanes_out)
         for kh in range(3)], axis=0).astype(jnp.bfloat16)          # (3*li, lo)

    # conv2: 3 kh taps (offset -1 vs. act1) + 1x1 shortcut (offset 2 vs. the
    # padded slab -> operand stays lane-aligned), stacked along K.
    t2_blocks = [pad_to(band_weight(w2s[:, :, kh, :], W, W, -1, 1),
                        lanes_out, lanes_out) for kh in range(3)]
    tsc = pad_to(band_weight(wscs[:, :, 0, :], W, W + 4, 2, 1), lanes_in, lanes_out)
    t2 = jnp.concatenate(t2_blocks + [tsc], axis=0).astype(jnp.bfloat16)  # (3*lo+li, lo)

    b1_row = pad_to(jnp.tile(params["b1"], W).reshape(1, W * cout),
                    1, lanes_out).astype(jnp.float32)
    b2_row = pad_to(jnp.tile(params["b2"] + params["bsc"], W).reshape(1, W * cout),
                    1, lanes_out).astype(jnp.float32)

    # NCHW -> bf16 padded channels-last slab (N, H+4, lanes_in), dense 128 lanes.
    x_nhwc = jnp.transpose(x_nchw, (0, 2, 3, 1))
    x_slab = jnp.pad(x_nhwc, ((0, 0), (2, 2), (2, 2), (0, 0))).reshape(
        N, H + 4, (W + 4) * cin)
    x_slab = jnp.pad(x_slab, ((0, 0), (0, 0), (0, lanes_in - (W + 4) * cin))
                     ).astype(jnp.bfloat16)

    nb = _pick_batch_block(N, H)
    grid = (N // nb,)
    M = nb * H

    flops = 2 * N * H * (3 * lanes_in * lanes_out
                         + (3 * lanes_out + lanes_in) * lanes_out)
    bytes_accessed = (x_slab.size * 2 + N * H * lanes_out * 4
                      + (t1.size + t2.size) * 2 + (b1_row.size + b2_row.size) * 4)

    kernel = functools.partial(nf_block_kernel, nb=nb, H=H,
                               lanes_in=lanes_in, lanes_out=lanes_out)

    out_flat = pl.pallas_call(
        kernel,
        out_shape=jax.ShapeDtypeStruct((N * H, lanes_out), jnp.float32),
        grid=grid,
        in_specs=[
            pl.BlockSpec((nb, H + 4, lanes_in), lambda i: (i, 0, 0)),
            pl.BlockSpec((3 * lanes_in, lanes_out), lambda i: (0, 0)),
            pl.BlockSpec((1, lanes_out), lambda i: (0, 0)),
            pl.BlockSpec((3 * lanes_out + lanes_in, lanes_out), lambda i: (0, 0)),
            pl.BlockSpec((1, lanes_out), lambda i: (0, 0)),
        ],
        out_specs=pl.BlockSpec((M, lanes_out), lambda i: (i, 0)),
        compiler_params=pltpu.CompilerParams(dimension_semantics=("parallel",)),
        cost_estimate=pl.CostEstimate(flops=flops, transcendentals=0,
                                      bytes_accessed=bytes_accessed),
    )(x_slab, t1, b1_row, t2, b2_row)

    # (N*H, lanes_out) -> (N, H, W, cout) -> NCHW
    out = out_flat.reshape(N, H, lanes_out)[:, :, :W * cout].reshape(N, H, W, cout)
    return jnp.transpose(out, (0, 3, 1, 2))


# ---------------------------------------------------------------------------
# Pure-JAX reference (for correctness check only).
# ---------------------------------------------------------------------------
def nf_block_reference(x_nchw, params):
    w1s = ws_standardize(params["w1"], params["g1"])
    w2s = ws_standardize(params["w2"], params["g2"])
    wscs = ws_standardize(params["wsc"], params["gsc"])
    dn = ("NCHW", "OIHW", "NCHW")

    def conv(x, w, b, pad, dil):
        y = lax.conv_general_dilated(
            x, w, window_strides=(1, 1), padding=((pad, pad), (pad, pad)),
            rhs_dilation=(dil, dil), dimension_numbers=dn)
        return y + b.reshape(1, -1, 1, 1)

    c1 = conv(x_nchw, w1s, params["b1"], pad=2, dil=2)
    a1 = jnp.maximum(c1, 0.0)
    c2 = conv(a1, w2s, params["b2"], pad=1, dil=1)
    sc = conv(x_nchw, wscs, params["bsc"], pad=0, dil=1)
    return jnp.maximum(c2 + sc, 0.0)


if __name__ == "__main__":
    key = jax.random.PRNGKey(0)
    k_x, k_p = jax.random.split(key)

    N, Cin, Cout, H, W = 2, 4, 8, 16, 16
    x = jax.random.normal(k_x, (N, Cin, H, W), jnp.float32)
    params = init_nf_block_params(k_p, Cin, Cout)

    out = jax.block_until_ready(nf_block_forward(x, params))
    ref = jax.block_until_ready(nf_block_reference(x, params))

    assert out.shape == (N, Cout, H, W)
    # bf16 MXU inputs with f32 accumulation -> relaxed tolerance vs f32 reference.
    max_err = float(jnp.max(jnp.abs(out - ref)))
    assert jnp.allclose(out, ref, atol=7e-2, rtol=3e-2), max_err

    print("KERNEL_OK")
</pallas_src>

<mosaic_0001>
module attributes {stable_mosaic.version = 11 : i64} {
  func.func @nf_block_kernel(%arg0: i32, %arg1: memref<1x20x128xbf16, #tpu.memory_space<vmem>>, %arg2: memref<384x128xbf16, #tpu.memory_space<vmem>>, %arg3: memref<1x128xf32, #tpu.memory_space<vmem>>, %arg4: memref<512x128xbf16, #tpu.memory_space<vmem>>, %arg5: memref<1x128xf32, #tpu.memory_space<vmem>>, %arg6: memref<16x128xf32, #tpu.memory_space<vmem>>) attributes {dimension_semantics = [#tpu.dimension_semantics<parallel>], iteration_bounds = array<i64: 2>, scalar_prefetch = 0 : i64, scratch_operands = 0 : i64, tpu.core_type = #tpu.core_type<tc>, window_params = [{transform_indices = @transform_0, window_bounds = array<i64: 1, 20, 128>}, {pipeline_mode = #tpu.pipeline_mode<synchronous>, transform_indices = @transform_1, window_bounds = array<i64: 384, 128>}, {pipeline_mode = #tpu.pipeline_mode<synchronous>, transform_indices = @transform_2, window_bounds = array<i64: 1, 128>}, {pipeline_mode = #tpu.pipeline_mode<synchronous>, transform_indices = @transform_3, window_bounds = array<i64: 512, 128>}, {pipeline_mode = #tpu.pipeline_mode<synchronous>, transform_indices = @transform_4, window_bounds = array<i64: 1, 128>}, {transform_indices = @transform_5, window_bounds = array<i64: 16, 128>}]} {
    %c0 = arith.constant 0 : index
    %c0_0 = arith.constant 0 : index
    %c0_1 = arith.constant 0 : index
    %0 = vector.load %arg1[%c0, %c0_0, %c0_1] : memref<1x20x128xbf16, #tpu.memory_space<vmem>>, vector<1x20x128xbf16>
    %1 = vector.extract_strided_slice %0 {offsets = [0, 0, 0], sizes = [1, 16, 128], strides = [1, 1, 1]} : vector<1x20x128xbf16> to vector<1x16x128xbf16>
    %2 = vector.shape_cast %1 : vector<1x16x128xbf16> to vector<16x128xbf16>
    %3 = vector.extract_strided_slice %0 {offsets = [0, 2, 0], sizes = [1, 16, 128], strides = [1, 1, 1]} : vector<1x20x128xbf16> to vector<1x16x128xbf16>
    %4 = vector.shape_cast %3 : vector<1x16x128xbf16> to vector<16x128xbf16>
    %5 = vector.extract_strided_slice %0 {offsets = [0, 4, 0], sizes = [1, 16, 128], strides = [1, 1, 1]} : vector<1x20x128xbf16> to vector<1x16x128xbf16>
    %6 = vector.shape_cast %5 : vector<1x16x128xbf16> to vector<16x128xbf16>
    %7 = tpu.concatenate %2, %4, %6 in 1 : vector<16x128xbf16>, vector<16x128xbf16>, vector<16x128xbf16> -> vector<16x384xbf16>
    %c0_2 = arith.constant 0 : index
    %c0_3 = arith.constant 0 : index
    %8 = vector.load %arg2[%c0_2, %c0_3] : memref<384x128xbf16, #tpu.memory_space<vmem>>, vector<384x128xbf16>
    %cst = arith.constant dense<0.000000e+00> : vector<16x128xf32>
    %9 = tpu.matmul %7, %8, %cst {dimension_numbers = #tpu.dot_dimension_numbers<[1], [0], [0], [1], [0, 0, 1, 1], [], []>} : vector<16x384xbf16>, vector<384x128xbf16>, vector<16x128xf32> -> vector<16x128xf32>
    %c0_4 = arith.constant 0 : index
    %c0_5 = arith.constant 0 : index
    %10 = vector.load %arg3[%c0_4, %c0_5] : memref<1x128xf32, #tpu.memory_space<vmem>>, vector<1x128xf32>
    %11 = vector.broadcast %10 : vector<1x128xf32> to vector<16x128xf32>
    %12 = arith.addf %9, %11 : vector<16x128xf32>
    %cst_6 = arith.constant 0.000000e+00 : f32
    %13 = vector.broadcast %cst_6 : f32 to vector<16x128xf32>
    %14 = arith.maximumf %12, %13 : vector<16x128xf32>
    %15 = arith.truncf %14 : vector<16x128xf32> to vector<16x128xbf16>
    %cst_7 = arith.constant 0.000000e+00 : bf16
    %16 = vector.broadcast %cst_7 : bf16 to vector<1x128xbf16>
    %17 = vector.extract_strided_slice %15 {offsets = [0, 0], sizes = [15, 128], strides = [1, 1]} : vector<16x128xbf16> to vector<15x128xbf16>
    %18 = tpu.concatenate %16, %17 in 0 : vector<1x128xbf16>, vector<15x128xbf16> -> vector<16x128xbf16>
    %19 = vector.extract_strided_slice %15 {offsets = [1, 0], sizes = [15, 128], strides = [1, 1]} : vector<16x128xbf16> to vector<15x128xbf16>
    %20 = tpu.concatenate %19, %16 in 0 : vector<15x128xbf16>, vector<1x128xbf16> -> vector<16x128xbf16>
    %21 = tpu.iota {dimensions = array<i32: 0>} : vector<16x128xi32>
    %c16_i32 = arith.constant 16 : i32
    %c0_i32 = arith.constant 0 : i32
    %22 = arith.cmpi eq, %c16_i32, %c0_i32 : i32
    %c1_i32 = arith.constant 1 : i32
    %23 = arith.select %22, %c1_i32, %c16_i32 : i32
    %24 = vector.broadcast %23 : i32 to vector<16x128xi32>
    %25 = arith.remsi %21, %24 : vector<16x128xi32>
    %c0_i32_8 = arith.constant 0 : i32
    %26 = vector.broadcast %c0_i32_8 : i32 to vector<16x128xi32>
    %27 = arith.cmpi ne, %25, %26 : vector<16x128xi32>
    %c0_i32_9 = arith.constant 0 : i32
    %28 = vector.broadcast %c0_i32_9 : i32 to vector<16x128xi32>
    %29 = arith.cmpi slt, %25, %28 : vector<16x128xi32>
    %c0_i32_10 = arith.constant 0 : i32
    %30 = arith.cmpi slt, %23, %c0_i32_10 : i32
    %31 = vector.broadcast %30 : i1 to vector<16x128xi1>
    %32 = vector.broadcast %31 : vector<16x128xi1> to vector<16x128xi1>
    %33 = arith.xori %29, %32 : vector<16x128xi1>
    %34 = arith.andi %33, %27 : vector<16x128xi1>
    %35 = vector.broadcast %23 : i32 to vector<16x128xi32>
    %36 = arith.addi %25, %35 : vector<16x128xi32>
    %37 = arith.select %34, %36, %25 : vector<16x128xi1>, vector<16x128xi32>
    %c0_i32_11 = arith.constant 0 : i32
    %38 = vector.broadcast %c0_i32_11 : i32 to vector<16x128xi32>
    %39 = arith.cmpi eq, %37, %38 : vector<16x128xi32>
    %cst_12 = arith.constant 0.000000e+00 : bf16
    %40 = vector.broadcast %cst_12 : bf16 to vector<16x128xbf16>
    %41 = arith.select %39, %40, %18 : vector<16x128xi1>, vector<16x128xbf16>
    %c15_i32 = arith.constant 15 : i32
    %42 = vector.broadcast %c15_i32 : i32 to vector<16x128xi32>
    %43 = arith.cmpi eq, %37, %42 : vector<16x128xi32>
    %cst_13 = arith.constant 0.000000e+00 : bf16
    %44 = vector.broadcast %cst_13 : bf16 to vector<16x128xbf16>
    %45 = arith.select %43, %44, %20 : vector<16x128xi1>, vector<16x128xbf16>
    %46 = vector.extract_strided_slice %0 {offsets = [0, 2, 0], sizes = [1, 16, 128], strides = [1, 1, 1]} : vector<1x20x128xbf16> to vector<1x16x128xbf16>
    %47 = vector.shape_cast %46 : vector<1x16x128xbf16> to vector<16x128xbf16>
    %48 = tpu.concatenate %41, %15, %45, %47 in 1 : vector<16x128xbf16>, vector<16x128xbf16>, vector<16x128xbf16>, vector<16x128xbf16> -> vector<16x512xbf16>
    %c0_14 = arith.constant 0 : index
    %c0_15 = arith.constant 0 : index
    %49 = vector.load %arg4[%c0_14, %c0_15] : memref<512x128xbf16, #tpu.memory_space<vmem>>, vector<512x128xbf16>
    %cst_16 = arith.constant dense<0.000000e+00> : vector<16x128xf32>
    %50 = tpu.matmul %48, %49, %cst_16 {dimension_numbers = #tpu.dot_dimension_numbers<[1], [0], [0], [1], [0, 0, 1, 1], [], []>} : vector<16x512xbf16>, vector<512x128xbf16>, vector<16x128xf32> -> vector<16x128xf32>
    %c0_17 = arith.constant 0 : index
    %c0_18 = arith.constant 0 : index
    %51 = vector.load %arg5[%c0_17, %c0_18] : memref<1x128xf32, #tpu.memory_space<vmem>>, vector<1x128xf32>
    %52 = vector.broadcast %51 : vector<1x128xf32> to vector<16x128xf32>
    %53 = arith.addf %50, %52 : vector<16x128xf32>
    %cst_19 = arith.constant 0.000000e+00 : f32
    %54 = vector.broadcast %cst_19 : f32 to vector<16x128xf32>
    %55 = arith.maximumf %53, %54 : vector<16x128xf32>
    %c0_20 = arith.constant 0 : index
    %c0_21 = arith.constant 0 : index
    %56 = vector.load %arg6[%c0_20, %c0_21] : memref<16x128xf32, #tpu.memory_space<vmem>>, vector<16x128xf32>
    tpu.vector_store %arg6[%c0_20, %c0_21], %55 {strides = array<i32>} : memref<16x128xf32, #tpu.memory_space<vmem>>, vector<16x128xf32>,
    return
  }
  func.func @transform_0(%arg0: i32) -> (i32, i32, i32) {
    %c0_i32 = arith.constant 0 : i32
    %c0_i32_0 = arith.constant 0 : i32
    %c0_i32_1 = arith.constant 0 : i32
    return %arg0, %c0_i32, %c0_i32_0 : i32, i32, i32
  }
  func.func @transform_1(%arg0: i32) -> (i32, i32) {
    %c0_i32 = arith.constant 0 : i32
    %c0_i32_0 = arith.constant 0 : i32
    %c0_i32_1 = arith.constant 0 : i32
    return %c0_i32, %c0_i32_0 : i32, i32
  }
  func.func @transform_2(%arg0: i32) -> (i32, i32) {
    %c0_i32 = arith.constant 0 : i32
    %c0_i32_0 = arith.constant 0 : i32
    %c0_i32_1 = arith.constant 0 : i32
    return %c0_i32, %c0_i32_0 : i32, i32
  }
  func.func @transform_3(%arg0: i32) -> (i32, i32) {
    %c0_i32 = arith.constant 0 : i32
    %c0_i32_0 = arith.constant 0 : i32
    %c0_i32_1 = arith.constant 0 : i32
    return %c0_i32, %c0_i32_0 : i32, i32
  }
  func.func @transform_4(%arg0: i32) -> (i32, i32) {
    %c0_i32 = arith.constant 0 : i32
    %c0_i32_0 = arith.constant 0 : i32
    %c0_i32_1 = arith.constant 0 : i32
    return %c0_i32, %c0_i32_0 : i32, i32
  }
  func.func @transform_5(%arg0: i32) -> (i32, i32) {
    %c0_i32 = arith.constant 0 : i32
    %c0_i32_0 = arith.constant 0 : i32
    return %arg0, %c0_i32 : i32, i32
  }
}

</mosaic_0001>

<bundles_post_ra>
// kernel: tpu_custom_call.1
= control target key start
LH: loop header
LB: loop body
LE: loop exit
PB: predicated region body
PF: predicated region fallthrough
CT: control target
= control target key end

     0   :  { %10 = vsyncpa [#allocation3], 0  ;;  %s1751_s0 = inlined_call_operand.vmem [shape: bf16[2,20,128], index: 0, kind: input, shape index: {}]   ;;  %s1752_s1 = inlined_call_operand.hbm [shape: bf16[384,128], index: 1, kind: input, shape index: {}]   ;;  %s1753_s2 = inlined_call_operand.vmem [shape: f32[1,128], index: 2, kind: input, shape index: {}]   ;;  %s1754_s3 = inlined_call_operand.hbm [shape: bf16[512,128], index: 3, kind: input, shape index: {}]   ;;  %s1755_s4 = inlined_call_operand.vmem [shape: f32[1,128], index: 4, kind: input, shape index: {}]   ;;  %s1756_s5 = inlined_call_operand.hbm [shape: f32[32,128], index: 5, kind: output, shape index: {}]  }
   0x1   :  { %11 = vsyncpa [#allocation6], 0 }
   0x2   :  { %12 = vsyncpa [#allocation4], 0 }
   0x3   :  { %14 = vsyncpa [#allocation4 + $0x1], 0  ;;  %s1551_s18 = smov 0   ;;  %s1553_s19 = smov 0  }
   0x4   :  { %s1555_s20 = smov 0   ;;  %s1557_s21 = smov 0  }
   0x5 LB: > { %s1572_s22 = sadd.s32 4294967295, %s1509_s21   ;;  %s1078_s23 = sadd.s32 4294967294, %s1509_s21   ;;  %s1509_s21 = sphi %s1557_s21, %s1776_s21   ;;  %s1505_s20 = sphi %s1555_s20, %s1775_s20   ;;  %s1501_s19 = sphi %s1553_s19, %s1774_s19   ;;  %s1497_s18 = sphi %s1551_s18, %s1773_s18  }
   0x6   : > { %s1576_s24 = sadd.s32 1, %s1509_s21   ;;  %s137_s25 = sadd.s32 1, %s1505_s20 }
   0x7   : > { %s134_s26 = ssub.s32 %s1509_s21, %s1576_s24  ;;  %p147_p0 = scmp.ne.s32.totalorder %s1505_s20, %s1501_s19 }
   0x8   : > { %p135_p1 = scmp.eq.s32.totalorder %s134_s26, 0  ;;  %p148_p2 = scmp.eq.s32.totalorder %s1572_s22, 1 }
   0x9   : > { %p153_p3 = scmp.ne.s32.totalorder %s1501_s19, %s1497_s18  ;;  %p154_p4 = scmp.eq.s32.totalorder %s1078_s23, 1 }
   0xa   : > { %s1587_s27 = scalar_select %p135_p1, %s1505_s20, %s137_s25  }
   0xb   : > { %p1589_p5 = por %p148_p2, %p147_p0  ;;  %p1593_p6 = por %p154_p4, %p153_p3 }
   0xc   : > { %p1079_p7 = scmp.ge.s32.totalorder %s1509_s21, 1  ;;  %p161_p8 = scmp.lt.s32.totalorder %s1509_s21, 3 }
   0xd   : > { %s1760_s28 = scalar_select %p1589_p5, 1, 0 }
   0xe   : > { %s1761_s29 = scalar_select %p1593_p6, 1, 0 }
   0xf   : > { %p1757_p9 = scmp.eq.s32.totalorder %s1572_s22, 0  ;;  %p1600_p10 = pnand %p1079_p7, %p161_p8 }
  0x10   : > { %s1511_s6 = smov [#allocation2]   ;;  %s1512_s9 = smov [#allocation5]  }
  0x11   : > { %s1762_s30 = scalar_select %p1600_p10, 1, 0 }
  0x12   : > { %s173_s7 = sshll.u32 %s1511_s6, 4  ;;  %p1268_p11 = pneg %p1600_p10  ;;  %s174_s7 = int_to_ptr.vmem [resolvable:$true] %s173_s7 }
  0x13   : > { %s189_s10 = sshll.u32 %s1512_s9, 4  ;;  %s1383_s13 = scalar_lea.hbm %s1752_s1, 3072  ;;  %s1612_s10 = int_to_ptr.vmem [resolvable:$true] %s189_s10 }
  0x14   : > { %p1608_p12 = pnand %p1757_p9, %p1268_p11  ;;  %p1384_p13 = scmp.ne.s32.totalorder %s1752_s1, %s1383_s13 }
  0x15   : > { %p1390_p3 = scmp.lt.u32.totalorder %s1383_s13, %s1752_s1 }
  0x16   : > { %p1385_p0 = pneg %p1608_p12 }
  0x18   : > { %p1386_p1 = pnand %p1385_p0, %p1384_p13 }
  0x1a   : > { %p1387_p2 = pneg %p1386_p1 }
  0x1c   : > { %p1392_p4 = pnand %p1390_p3, %p1387_p2 }
  0x1e   : > { %1395 = shalt.err (!%p1392_p4)
}
  0x1f   : > { %s1396_s23 = scalar_lea.vmem %s174_s7, 3072  ;;  %p1404_p9 = scmp.lt.s32.totalorder %s174_s7, %s174_s7 }
  0x20   : > { %p1397_p7 = scmp.ne.s32.totalorder %s174_s7, %s1396_s23  ;;  %p1405_p6 = scmp.lt.s32.totalorder %s1396_s23, %s1396_s23 }
  0x22   : > { %p1399_p8 = pnand %p1397_p7, %p1385_p0  ;;  %p1406_p5 = por %p1405_p6, %p1404_p9 }
  0x24   : > { %p1400_p11 = pneg %p1399_p8 }
  0x26   : > { %p1407_p10 = pnand %p1406_p5, %p1400_p11 }
  0x28   : > { %1410 = shalt.err (!%p1407_p10)
}
  0x29   : > { %s1513_s25 = smov 64   ;;  %s1514_s26 = smov 4  }
  0x2a   : > { %1271 = dma.hbm_to_vmem [thread:$0]  (!%p1608_p12), %s1752_s1, 3072, %s174_s7, [#allocation3], %s1513_s25, %s1513_s25, %s1514_s26  }
  0x2b   : > { %s1411_s13 = scalar_lea.hbm %s1754_s3, 4096 }
  0x2c   : > { %p1412_p13 = scmp.ne.s32.totalorder %s1754_s3, %s1411_s13  ;;  %p1418_p9 = scmp.lt.u32.totalorder %s1411_s13, %s1754_s3 }
  0x2e   : > { %p1414_p5 = pnand %p1412_p13, %p1385_p0 }
  0x30   : > { %p1415_p6 = pneg %p1414_p5 }
  0x32   : > { %p1420_p10 = pnand %p1418_p9, %p1415_p6 }
  0x34   : > { %1423 = shalt.err (!%p1420_p10)
}
  0x35   : > { %s1424_s7 = scalar_lea.vmem %s1612_s10, 4096  ;;  %p1432_p4 = scmp.lt.s32.totalorder %s1612_s10, %s1612_s10 }
  0x36   : > { %p1425_p1 = scmp.ne.s32.totalorder %s1612_s10, %s1424_s7  ;;  %p1433_p7 = scmp.lt.s32.totalorder %s1424_s7, %s1424_s7 }
  0x38   : > { %p1427_p2 = pnand %p1425_p1, %p1385_p0  ;;  %p1434_p8 = por %p1433_p7, %p1432_p4 }
  0x3a   : > { %p1428_p3 = pneg %p1427_p2 }
  0x3c   : > { %p1435_p11 = pnand %p1434_p8, %p1428_p3 }
  0x3e   : > { %1438 = shalt.err (!%p1435_p11)
}
  0x3f   : > { %1274 = dma.hbm_to_vmem [thread:$0]  (!%p1608_p12), %s1754_s3, 4096, %s1612_s10, [#allocation6], %s1513_s25, %s1513_s25, %s1514_s26  }
  0x40   : > { %p1764_p13 = scmp.ne.s32.totalorder %s1762_s30, 0 }
  0x41   : > { %p1765_p5 = scmp.eq.s32.totalorder (!%p1764_p13), %s1572_s22, 0 }
  0x42   : > { %216 = sbr.rel (%p1764_p13) target bundleno = 582 (0x246), region = 40 }
  0x49   : > { %1484 = dma.done.wait (%p1765_p5), [#allocation3], 3072   ;;  %p1766_p0 = pmov %p1765_p5 }
  0x4b   : > { %1486 = vsyncadd (%p1766_p0), [#allocation3], 4294964224  ;;  %p1767_p6 = pmov %p1766_p0 }
  0x4c   : > { %p1768_p9 = pmov %p1766_p0 }
  0x4d   : > { %1488 = dma.done.wait (%p1767_p6), [#allocation6], 4096  }
  0x4e   : > { %1490 = vsyncadd (%p1768_p9), [#allocation6], 4294963200  ;;  %v1515_v0 = vmov 0.0   ;;  %vm1516_vm0 = vmmov 0   ;;  %v1325_v1 = vld [vmem:[#allocation2 + $0x40] sm:$0xff]   ;;  %v1328_v4 = vld [vmem:[#allocation2 + $0x48] sm:$0xff]  }
  0x4f   : > { %1237 = vmatprep.subr.bf16.mxu1 %v1515_v0  ;;  %1253 = vmatprep.mubr.msk.bf16.mxu1 %vm1516_vm0, %v1515_v0  ;;  %v1326_v2 = vld [vmem:[#allocation2] sm:$0xff]   ;;  %v1329_v5 = vld [vmem:[#allocation2 + $0x8] sm:$0xff]   ;;  %v1331_v7 = vld [vmem:[#allocation2 + $0x50] sm:$0xff]   ;;  %p248_p12 = scmp.lt.s32.totalorder %s1572_s22, 1  ;;  %vm269_vm1 = vcmask 1046528   ;;  %vm274_vm2 = vcmask 1045504  }
  0x50   : > { %1162 = vmatprep.subr.bf16.mxu0 %v1325_v1  ;;  %v1327_v3 = vld [vmem:[#allocation2 + $0x80] sm:$0xff]   ;;  %v1330_v6 = vld [vmem:[#allocation2 + $0x88] sm:$0xff]   ;;  %v1332_v8 = vld [vmem:[#allocation2 + $0x10] sm:$0xff]   ;;  %v582_v1 = vlaneseq  ;;  %vm571_vm8 = vcmask 1040384   ;;  %vm572_vm9 = vsmask.f32 256 }
  0x51   : > { %1163 = vmatpush3.bf16.msra.mxu0 %v1326_v2  ;;  %1238 = vmatpush3.bf16.msra.mxu1 %v1327_v3  ;;  %v1333_v9 = vld [vmem:[#allocation2 + $0x90] sm:$0xff]   ;;  %v1334_v10 = vld [vmem:[#allocation2 + $0x58] sm:$0xff]   ;;  %v1337_v13 = vld [vmem:[#allocation2 + $0x60] sm:$0xff]   ;;  %s249_s30 = scalar_select %p248_p12, %s1572_s22, 1  ;;  %vm578_vm10 = vcmask 1047552  }
  0x52   : > { %1164 = vmatprep.subr.bf16.mxu0 %v1328_v4  ;;  %1239 = vmatprep.subr.bf16.mxu1 %v1515_v0  ;;  %v1335_v11 = vld [vmem:[#allocation2 + $0x18] sm:$0xff]   ;;  %v1338_v14 = vld [vmem:[#allocation2 + $0x20] sm:$0xff]   ;;  %v1340_v16 = vld [vmem:[#allocation2 + $0x68] sm:$0xff]   ;;  %v583_v2 = vshrl.u32 %v582_v1, 7  ;;  %vm579_vm11 = vsmask.f32 7424 }
  0x53   : > { %v1336_v12 = vld [vmem:[#allocation2 + $0x98] sm:$0xff]   ;;  %v1339_v15 = vld [vmem:[#allocation2 + $0xa0] sm:$0xff]   ;;  %s1257_s8 = smul.u32 12, %s249_s30  ;;  %v1341_v17 = vld [vmem:[#allocation2 + $0x28] sm:$0xff]   ;;  %s245_s12 = sand.u32 1, %s1501_s19  }
  0x54   : > { %v1342_v18 = vld [vmem:[#allocation2 + $0xa8] sm:$0xff]   ;;  %v1343_v19 = vld [vmem:[#allocation2 + $0x70] sm:$0xff]   ;;  %v1346_v22 = vld [vmem:[#allocation2 + $0x78] sm:$0xff]   ;;  %v584_v3 = vadd.s32 8, %v583_v2  ;;  %v589_v4 = vand.u32 15, %v583_v2  ;;  %s1086_s13 = sshll.u32 %s245_s12, 4 }
  0x55   : > { %1165 = vmatpush3.bf16.msra.mxu0 %v1329_v5  ;;  %1240 = vmatpush3.bf16.msra.mxu1 %v1330_v6  ;;  %v1344_v20 = vld [vmem:[#allocation2 + $0x30] sm:$0xff]   ;;  %s252_s26 = scalar_lea.vmem %s1751_s0, %s1257_s8  ;;  %v1347_v25 = vld [vmem:[#allocation2 + $0x38] sm:$0xff]   ;;  %v1351_v31 = vld [vmem:[#allocation5 + $0x40] sm:$0xff]   ;;  %s247_s16 = scalar_lea.vmem [#allocation7], %s1086_s13 }
  0x56   : > { %1166 = vmatprep.subr.bf16.mxu0 %v1331_v7  ;;  %1241 = vmatprep.subr.bf16.mxu1 %v1515_v0  ;;  %v1345_v21 = vld [vmem:[#allocation2 + $0xb0] sm:$0xff]   ;;  %v1348_v23 = vld [vmem:[%s252_s26] sm:$0xff]   ;;  %v1349_v24 = vld [vmem:[%s252_s26 + $0x8] ss:$0 sps:$4 sm:$0x33]   ;;  %v596_v5 = vand.u32 15, %v584_v3 }
  0x57   : > { %v270_v26 = vrot.slane %v1348_v23, 1  ;;  %v271_v27 = vrot.slane %v1349_v24, 1  ;;  %v1350_v28 = vld [vmem:[#allocation2 + $0xb8] sm:$0xff]   ;;  %v275_v29 = vrot.slane %v1348_v23, 2  ;;  %v276_v30 = vrot.slane %v1349_v24, 2  ;;  %v1352_v32 = vld [vmem:[#allocation5 + $0xc0] sm:$0xff]   ;;  %vm612_vm5 = vmpackc.low %vm1516_vm0, %vm1516_vm0 }
  0x58   : > { %v1353_v34 = vld [vmem:[#allocation5] sm:$0xff]   ;;  %v1355_v36 = vld [vmem:[#allocation5 + $0x48] sm:$0xff]   ;;  %v1359_v41 = vld [vmem:[#allocation5 + $0x50] sm:$0xff]   ;;  %vm1689_vm3 = vcmp.eq.s32.totalorder %v589_v4, 0  ;;  %vm621_vm4 = vcmp.eq.s32.totalorder %v596_v5, 15  ;;  %s994_s17 = sshll.u32 %s247_s16, 4  ;;  %s1703_s17 = int_to_ptr.vmem [resolvable:$true] %s994_s17 }
  0x59   : > { %1167 = vmatpush3.bf16.msra.mxu0 %v1332_v8  ;;  %1242 = vmatpush3.bf16.msra.mxu1 %v1333_v9  ;;  %v272_v33 = vsel %vm269_vm1, %v270_v26, %v271_v27  ;;  %v1354_v35 = vld [vmem:[#allocation5 + $0x80] sm:$0xff]   ;;  %v277_v37 = vsel %vm274_vm2, %v275_v29, %v276_v30  ;;  %v1356_v38 = vld [vmem:[#allocation5 + $0xc8] sm:$0xff]   ;;  %v1360_v42 = vld [vmem:[#allocation5 + $0xd0] sm:$0xff]   ;;  %s1159_s7 = sshll.u32 %s1572_s22, 8  ;;  %s1710_s8 = scalar_lea.sflag [#allocation4], %s245_s12 }
  0x5a   : > { %1168 = vmatprep.subr.bf16.mxu0 %v1334_v10  ;;  %1243 = vmatprep.subr.bf16.mxu1 %v1515_v0  ;;  %v1357_v39 = vld [vmem:[#allocation5 + $0x8] sm:$0xff]   ;;  %v1361_v43 = vld [vmem:[#allocation5 + $0x10] sm:$0xff]   ;;  %v1363_v45 = vld [vmem:[#allocation5 + $0x58] sm:$0xff]   ;;  %s1708_s30 = scalar_lea.hbm %s1756_s5, %s1159_s7  ;;  %s1439_s10 = scalar_lea.vmem %s1703_s17, 256 }
  0x5b   : > { %510 = vmatprep.mubr.bf16.mxu0 %v272_v33  ;;  %v1358_v40 = vld [vmem:[#allocation5 + $0x88] sm:$0xff]   ;;  %v1362_v44 = vld [vmem:[#allocation5 + $0x90] sm:$0xff]   ;;  %v1364_v46 = vld [vmem:[#allocation5 + $0xd8] sm:$0xff]   ;;  %p1440_p10 = scmp.ne.s32.totalorder %s1703_s17, %s1439_s10  ;;  %p1771_p1 = scmp.ne.s32.totalorder %s1760_s28, 0 }
  0x5c   : > { %v1365_v47 = vld [vmem:[#allocation5 + $0x18] sm:$0xff]   ;;  %v1367_v49 = vld [vmem:[#allocation5 + $0x60] sm:$0xff]   ;;  %v1371_v53 = vld [vmem:[#allocation5 + $0x68] sm:$0xff]   ;;  %s1518_s22 = smov [#allocation7]  }
  0x5d   : > { %1169 = vmatpush3.bf16.msra.mxu0 %v1335_v11  ;;  %1244 = vmatpush3.bf16.msra.mxu1 %v1336_v12  ;;  %v1366_v48 = vld [vmem:[#allocation5 + $0x98] sm:$0xff]   ;;  %v1368_v50 = vld [vmem:[#allocation5 + $0xe0] sm:$0xff]   ;;  %v1372_v54 = vld [vmem:[#allocation5 + $0xe8] sm:$0xff]   ;;  %p1441_p2 = pnand %p1440_p10, %p1771_p1  ;;  %s1443_s25 = sshll.u32 %s1518_s22, 4  ;;  %s1444_s25 = int_to_ptr.vmem [resolvable:$false] %s1443_s25 }
  0x5e   : > { %1170 = vmatprep.subr.bf16.mxu0 %v1337_v13  ;;  %1245 = vmatprep.subr.bf16.mxu1 %v1515_v0  ;;  %v1369_v51 = vld [vmem:[#allocation5 + $0x20] sm:$0xff]   ;;  %v1373_v55 = vld [vmem:[#allocation5 + $0x28] sm:$0xff]   ;;  %v1375_v57 = vld [vmem:[#allocation5 + $0x70] sm:$0xff]   ;;  %s1445_s26 = scalar_lea.vmem %s1444_s25, 512  ;;  %p1446_p4 = scmp.lt.s32.totalorder %s1703_s17, %s1444_s25 }
  0x5f   : > { %v1370_v52 = vld [vmem:[#allocation5 + $0xa0] sm:$0xff]   ;;  %v1374_v56 = vld [vmem:[#allocation5 + $0xa8] sm:$0xff]   ;;  %v1376_v58 = vld [vmem:[#allocation5 + $0xf0] sm:$0xff]   ;;  %p1442_p3 = pneg %p1441_p2  ;;  %p1447_p7 = scmp.lt.s32.totalorder %s1445_s26, %s1439_s10 }
  0x60   : > { %v1377_v59 = vld [vmem:[#allocation5 + $0x30] sm:$0xff]   ;;  %v1379_v61 = vld [vmem:[#allocation5 + $0x78] sm:$0xff]   ;;  %v1090_v8 = vld [vmem:[%s1753_s2] ss:$0 sm:$0xff] }
  0x61   : > { %1171 = vmatpush3.bf16.msra.mxu0 %v1338_v14  ;;  %1246 = vmatpush3.bf16.msra.mxu1 %v1339_v15  ;;  %v1378_v60 = vld [vmem:[#allocation5 + $0xb0] sm:$0xff]   ;;  %v1380_v62 = vld [vmem:[#allocation5 + $0xf8] sm:$0xff]   ;;  %vm611_vm6 = vmpackc.low %vm1689_vm3, %vm1689_vm3  ;;  %p1448_p8 = por %p1447_p7, %p1446_p4 }
  0x62   : > { %1172 = vmatprep.subr.bf16.mxu0 %v1340_v16  ;;  %1247 = vmatprep.subr.bf16.mxu1 %v1515_v0  ;;  %v1381_v63 = vld [vmem:[#allocation5 + $0x38] sm:$0xff]   ;;  %vm623_vm7 = vmpackc.low %vm621_vm4, %vm621_vm4 }
  0x63   : > { %vm573_vm12 = vmand %vm571_vm8, %vm572_vm9  ;;  %p1449_p11 = pnand %p1448_p8, %p1442_p3 }
  0x64   : > { %vm580_vm13 = vmand %vm578_vm10, %vm579_vm11 }
  0x65   : > { %1173 = vmatpush3.bf16.msra.mxu0 %v1341_v17  ;;  %1248 = vmatpush3.bf16.msra.mxu1 %v1342_v18 }
  0x66   : > { %1174 = vmatprep.subr.bf16.mxu0 %v1343_v19  ;;  %1249 = vmatprep.subr.bf16.mxu1 %v1515_v0 }
  0x69   : > { %1175 = vmatpush3.bf16.msra.mxu0 %v1344_v20  ;;  %1250 = vmatpush3.bf16.msra.mxu1 %v1345_v21 }
  0x6a   : > { %1176 = vmatprep.subr.bf16.mxu0 %v1346_v22  ;;  %1251 = vmatprep.subr.bf16.mxu1 %v1515_v0  ;;  %v1382_v0 = vld [vmem:[#allocation5 + $0xb8] sm:$0xff]   ;;  %v1517_v22 = vmov 0  }
  0x6b   : > { %v613_v24 = vsel %vm611_vm6, 65537, %v1517_v22 }
  0x6d   : > { %1177 = vmatpush3.bf16.msra.mxu0 %v1347_v25  ;;  %1252 = vmatpush3.bf16.msra.mxu1 %v1350_v28  ;;  %v625_v25 = vsel %vm623_vm7, 65537, %v1517_v22 }
  0x6e   : > { %1193 = vmatprep.subr.bf16.mxu0 %v1351_v31  ;;  %1215 = vmatprep.subr.bf16.mxu1 %v1352_v32 }
  0x70   : > { %511 = vmatmul.mubr.bf16.vlgmr.msra.gmra.mrb[0].mxu0 %v1348_v23  ;;  %1254 = vmatmul.mubr.bf16.vlgmr.msra.gmra.mrb[0].mxu1 %v277_v37  ;;  %v614_v23 = vsel %vm612_vm5, 65537, %v1517_v22 }
  0x71   : > { %1194 = vmatpush3.bf16.msra.mxu0 %v1353_v34  ;;  %1216 = vmatpush3.bf16.msra.mxu1 %v1354_v35  ;;  %v1115_v29 = vcombine.low %v613_v24, %v614_v23  ;;  %v1116_v30 = vcombine.low %v614_v23, %v625_v25 }
  0x72   : > { %1195 = vmatprep.subr.bf16.mxu0 %v1355_v36  ;;  %1217 = vmatprep.subr.bf16.mxu1 %v1356_v38 }
  0x73   : > { %967 = vmatprep.mubr.bf16.mxu1 %v272_v33  ;;  %vm1160_vm14 = vcmp.eq.s16.totalorder %v1115_v29, 0  ;;  %vm1161_vm15 = vcmp.eq.s16.totalorder %v1116_v30, 0 }
  0x75   : > { %1196 = vmatpush3.bf16.msra.mxu0 %v1357_v39  ;;  %1218 = vmatpush3.bf16.msra.mxu1 %v1358_v40 }
  0x76   : > { %1197 = vmatprep.subr.bf16.mxu0 %v1359_v41  ;;  %1219 = vmatprep.subr.bf16.mxu1 %v1360_v42  ;;  %v1117_v41 = vld [vmem:[%s1755_s4] ss:$0 sm:$0xff] }
  0x79   : > { %1198 = vmatpush3.bf16.msra.mxu0 %v1361_v43  ;;  %1220 = vmatpush3.bf16.msra.mxu1 %v1362_v44 }
  0x7a   : > { %1199 = vmatprep.subr.bf16.mxu0 %v1363_v45  ;;  %1221 = vmatprep.subr.bf16.mxu1 %v1364_v46 }
  0x7d   : > { %1200 = vmatpush3.bf16.msra.mxu0 %v1365_v47  ;;  %1222 = vmatpush3.bf16.msra.mxu1 %v1366_v48 }
  0x7e   : > { %1201 = vmatprep.subr.bf16.mxu0 %v1367_v49  ;;  %1223 = vmatprep.subr.bf16.mxu1 %v1368_v50 }
  0x81   : > { %1202 = vmatpush3.bf16.msra.mxu0 %v1369_v51  ;;  %1224 = vmatpush3.bf16.msra.mxu1 %v1370_v52 }
  0x82   : > { %1203 = vmatprep.subr.bf16.mxu0 %v1371_v53  ;;  %1225 = vmatprep.subr.bf16.mxu1 %v1372_v54 }
  0x85   : > { %1204 = vmatpush3.bf16.msra.mxu0 %v1373_v55  ;;  %1226 = vmatpush3.bf16.msra.mxu1 %v1374_v56 }
  0x86   : > { %1205 = vmatprep.subr.bf16.mxu0 %v1375_v57  ;;  %1227 = vmatprep.subr.bf16.mxu1 %v1376_v58 }
  0x89   : > { %1206 = vmatpush3.bf16.msra.mxu0 %v1377_v59  ;;  %1228 = vmatpush3.bf16.msra.mxu1 %v1378_v60 }
  0x8a   : > { %1207 = vmatprep.subr.bf16.mxu0 %v1379_v61  ;;  %1229 = vmatprep.subr.bf16.mxu1 %v1380_v62 }
  0x8d   : > { %1208 = vmatpush3.bf16.msra.mxu0 %v1381_v63  ;;  %1230 = vmatpush3.bf16.msra.mxu1 %v1382_v0 }
 0x143   : > { %v1178_v6 = vpop.f32.mrb[0].mxu0  ;;  %v553_v9 = vpop.f32.mrb[0].mxu1 }
 0x144   : > { %v1179_v7 = vpop.f32.mrb[1].mxu0  ;;  %v1255_v12 = vpop.f32.mrb[1].mxu1 }
 0x145   : > { %v1180_v10 = vadd.f32 %v1179_v7, %v1178_v6  ;;  %v1181_v11 = vpop.f32.mrb[2].mxu0  ;;  %v556_v15 = vpop.f32.mrb[2].mxu1 }
 0x146   : > { %v1182_v14 = vpop.f32.mrb[3].mxu0  ;;  %v1256_v18 = vpop.f32.mrb[3].mxu1 }
 0x147   : > { %v513_v16 = vadd.f32 %v1180_v10, %v1090_v8  ;;  %v1183_v17 = vadd.f32 %v1182_v14, %v1181_v11 }
 0x149   : > { %v554_v19 = vadd.f32 %v553_v9, %v513_v16  ;;  %v516_v20 = vadd.f32 %v1183_v17, %v1090_v8 }
 0x14b   : > { %v557_v21 = vadd.f32 %v556_v15, %v516_v20  ;;  %v560_v26 = vmax.f32 %v554_v19, 0.0 }
 0x14d   : > { %v561_v27 = vmax.f32 %v557_v21, 0.0 }
 0x14f   : > { %v562_v28 = vpack.c.bf16 %v561_v27, %v560_v26 }
 0x151   : > { %v564_v31 = vshrl.u32 %v562_v28, 16  ;;  %v567_v32 = vshll.u32 %v562_v28, 16  ;;  %926 = vmatprep.mubr.bf16.mxu0 %v562_v28 }
 0x153   : > { %v566_v33 = vrot.slane %v564_v31, 7  ;;  %v575_v34 = vrot.slane %v567_v32, 1 }
 0x155   : > { %v569_v35 = vor.u32 %v567_v32, %v566_v33  ;;  %v576_v36 = vor.u32 %v575_v34, %v564_v31 }
 0x157   : > { %v574_v37 = vsel %vm573_vm12, 0, %v569_v35  ;;  %v581_v38 = vsel %vm580_vm13, %v576_v36, 0 }
 0x158   : > { %1151 = vmatmul.mubr.msk.bf16.vlgmr.msra.gmra.mrb[4].mxu0 %vm1160_vm14, %v574_v37  ;;  %1153 = vmatmul.mubr.msk.bf16.vlgmr.msra.gmra.mrb[4].mxu1 %vm1161_vm15, %v581_v38 }
 0x22b   : > { %v1209_v39 = vpop.f32.mrb[4].mxu0  ;;  %v1231_v40 = vpop.f32.mrb[4].mxu1 }
 0x22c   : > { %v1210_v42 = vpop.f32.mrb[5].mxu0  ;;  %v1232_v43 = vpop.f32.mrb[5].mxu1 }
 0x22d   : > { %v1211_v44 = vadd.f32 %v1210_v42, %v1209_v39  ;;  %v1233_v45 = vadd.f32 %v1232_v43, %v1231_v40  ;;  %v1212_v46 = vpop.f32.mrb[6].mxu0  ;;  %v1234_v47 = vpop.f32.mrb[6].mxu1 }
 0x22e   : > { %v1213_v48 = vpop.f32.mrb[7].mxu0  ;;  %v1235_v49 = vpop.f32.mrb[7].mxu1 }
 0x22f   : > { %v929_v50 = vadd.f32 %v1211_v44, %v1117_v41  ;;  %v1214_v51 = vadd.f32 %v1213_v48, %v1212_v46  ;;  %v1236_v52 = vadd.f32 %v1235_v49, %v1234_v47 }
 0x231   : > { %v970_v53 = vadd.f32 %v1233_v45, %v929_v50  ;;  %v932_v54 = vadd.f32 %v1214_v51, %v1117_v41 }
 0x233   : > { %v976_v55 = vmax.f32 %v970_v53, 0.0  ;;  %v973_v56 = vadd.f32 %v1236_v52, %v932_v54 }
 0x235   : > { %978 = vst [vmem:[%s247_s16] sm:$0xff] %v976_v55  ;;  %v977_v57 = vmax.f32 %v973_v56, 0.0 }
 0x237   : > { %979 = vst [vmem:[%s247_s16 + $0x8] sm:$0xff] %v977_v57 }
 0x238   : > { %1452 = shalt.err (!%p1449_p11)
}
 0x239   : > { %s1453_s9 = scalar_lea.hbm %s1708_s30, 256  ;;  %s1457_s13 = scalar_lea.hbm %s1756_s5, 512 }
 0x23a   : > { %p1454_p13 = scmp.ne.s32.totalorder %s1708_s30, %s1453_s9  ;;  %p1458_p6 = scmp.lt.u32.totalorder %s1708_s30, %s1756_s5 }
 0x23b   : > { %p1459_p9 = scmp.lt.u32.totalorder %s1457_s13, %s1453_s9  ;;  %p1461_p10 = scmp.lt.u32.totalorder %s1453_s9, %s1708_s30 }
 0x23c   : > { %p1455_p5 = pnand %p1454_p13, %p1771_p1 }
 0x23d   : > { %p1460_p12 = por %p1459_p9, %p1458_p6 }
 0x23e   : > { %p1456_p0 = pneg %p1455_p5 }
 0x23f   : > { %p1462_p2 = por %p1461_p10, %p1460_p12 }
 0x241   : > { %p1463_p3 = pnand %p1462_p2, %p1456_p0 }
 0x243   : > { %1466 = shalt.err (!%p1463_p3)
}
 0x244   : > { %s1519_s16 = smov 128   ;;  %s1520_s7 = smov 8  }
 0x245   : > { %1266 = dma.vmem_to_hbm [thread:$0]  (%p1771_p1), %s1703_s17, 256, %s1708_s30, %s1710_s8, %s1519_s16, %s1519_s16, %s1520_s7  }
 0x246 PF: > { %p1283_p4 = scmp.ge.s32.totalorder %s1509_s21, 2  ;;  %s1009_s23 = sand.u32 1, %s1497_s18  }
 0x247   : > { %p1772_p7 = scmp.ne.s32.totalorder %s1761_s29, 0  ;;  %s1010_s6 = scalar_lea.sflag [#allocation4], %s1009_s23 }
 0x249   : > { %p1276_p8 = pnand %p1283_p4, %p1772_p7 }
 0x24b   : > { %1492 = dma.done.wait (!%p1276_p8), %s1010_s6, 256  }
 0x24c   : > { %1494 = vsyncadd (!%p1276_p8), %s1010_s6, 4294967040  ;;  %p17_p11 = scmp.ge.s32.totalorder %s1576_s24, 4   ;;  %s1773_s18 = smov %s1501_s19 }
 0x24d   : > { %s1774_s19 = smov %s1505_s20  ;;  %s1775_s20 = smov %s1587_s27 }
 0x24e   : > { %s1776_s21 = smov %s1576_s24  ;;  %19 = sbr.rel (!%p17_p11) target bundleno = 5 (0x5), region = 84 }
 0x255   :  { %1015 = vsyncpa [#allocation3], 1 }
 0x256   :  { %1017 = vsyncpa [#allocation3 + $0x1], 1 }
 0x257   :  { %1018 = vsyncpa [#allocation6], 1 }
 0x258   :  { %1019 = vsyncpa [#allocation4], 1 }
 0x259   :  { %1021 = vsyncpa [#allocation4 + $0x1], 1 }

</bundles_post_ra>
